<compile_context>
chip_gen: v6e
topology: v6e:2x2x1
jax: 0.10.0
libtpu: 0.0.40
codegen_flags: <defaults>
</compile_context>

<pallas_src>
import functools

import jax
import jax.numpy as jnp
from jax.experimental import pallas as pl
from jax.experimental.pallas import tpu as pltpu


def _round_up(v, m):
    return (v + m - 1) // m * m


def _encode_attend_kernel(x_ref, we_ref, be_ref, w1_ref, b1_ref, w2_ref,
                          b2_ref, h_ref, scores_ref):
    # ---- encoder: relu(x @ We + be) ------------------------------------ MXU
    h = jnp.dot(x_ref[...], we_ref[...], preferred_element_type=jnp.float32)
    h = jnp.maximum(h + be_ref[...], 0.0)                       # (TN, D) f32
    h_ref[...] = h.astype(h_ref.dtype)

    # ---- all K branch hidden projections in ONE wide matmul ------------ MXU
    # a[n, k*L + l] = tanh(sum_d h[n, d] * W1[k, d, l] + b1[k, l])
    a = jnp.tanh(
        jnp.dot(h.astype(w1_ref.dtype), w1_ref[...],
                preferred_element_type=jnp.float32)
        + b1_ref[...])                                          # (TN, K*L) f32

    # ---- per-branch (L -> 1) projection as one tiny MXU matmul -----------
    # w2 is block-diagonal: column k holds W2[k,:,0] in rows [k*L, (k+1)*L),
    # so the matmul yields all K branch scores lane-contiguously at once.
    scores_ref[...] = (
        jnp.dot(a, w2_ref[...], preferred_element_type=jnp.float32)
        + b2_ref[...]).astype(scores_ref.dtype)


def _choose_tile(n, block_n):
    """Instance-axis tile: multiple of 16 (bf16 sublane packing) unless the
    whole bag fits in one block; aim for >=2 grid steps (v7x megacore)."""
    if n <= 16:
        return n
    return max(16, min(_round_up(block_n, 16), _round_up(pl.cdiv(n, 2), 16)))


@functools.partial(jax.jit, static_argnames=("block_n",))
def encode_and_multiple_attend(x, We, be, W1, b1, W2, b2, *, block_n=512):
    N, F = x.shape
    D = We.shape[1]
    K, _, L = W1.shape
    KL = K * L

    # ---- free layout plumbing (outside the kernel) -----------------------
    x16 = x.astype(jnp.bfloat16)
    We16 = We.astype(jnp.bfloat16)
    be2 = be.reshape(1, D).astype(jnp.float32)
    W1f = jnp.transpose(W1, (1, 0, 2)).reshape(D, KL).astype(jnp.bfloat16)
    b1f = b1.reshape(1, KL).astype(jnp.float32)
    # Block-diagonal W2 columns: column k = [0..0, W2[k,:,0], 0..0]^T  (K*L, K)
    eye = jnp.eye(K, dtype=jnp.float32)
    w2_cols = (eye[:, :, None] * W2[:, :, 0].astype(jnp.float32)[None, :, :]
               ).reshape(K, KL).T
    b2f = b2.reshape(1, K).astype(jnp.float32)

    # ---- tile the instance axis (no padded HBM copy of x) ----------------
    tn = _choose_tile(N, block_n)
    grid = (pl.cdiv(N, tn),)

    # ---- VMEM budget for this tiling (double-buffered ins/outs) ----------
    tile_bytes = (2 * tn * F * 2            # x tile (bf16)
                  + 2 * tn * D * 4          # h tile (f32)
                  + 2 * tn * K * 4          # scores tile (f32)
                  + 2 * (F * D * 2 + D * 4 + D * KL * 2 + KL * 4
                         + KL * K * 4 + K * 4))
    vmem_limit = int(min(64 * 2 ** 20, max(16 * 2 ** 20, 2 * tile_bytes)))
    # TODO(synk): on v7x, pipeline_mode=pl.Buffered(1) on the grid-invariant
    # weight specs would also drop their second pipeline buffer from the budget.

    flops = (2 * N * F * D            # encoder matmul
             + 2 * N * D * KL         # fused branch matmul
             + 2 * N * KL * K)        # block-diagonal score matmul
    bytes_accessed = (2 * (N * F + F * D + D * KL)         # bf16 operands
                      + 4 * (D + KL + KL * K + K           # f32 biases / W2
                             + N * D + N * K))             # f32 outputs

    h, scores = pl.pallas_call(
        _encode_attend_kernel,
        grid=grid,
        in_specs=[
            pl.BlockSpec((tn, F), lambda i: (i, 0)),      # x  (tiled over N)
            pl.BlockSpec((F, D), lambda i: (0, 0)),       # We
            pl.BlockSpec((1, D), lambda i: (0, 0)),       # be
            pl.BlockSpec((D, KL), lambda i: (0, 0)),      # W1 (branches fused)
            pl.BlockSpec((1, KL), lambda i: (0, 0)),      # b1 (branches fused)
            pl.BlockSpec((KL, K), lambda i: (0, 0)),      # W2 block-diag cols
            pl.BlockSpec((1, K), lambda i: (0, 0)),       # b2 (stacked)
        ],
        out_specs=[
            pl.BlockSpec((tn, D), lambda i: (i, 0)),      # instance encodings
            pl.BlockSpec((tn, K), lambda i: (i, 0)),      # lane-dense scores
        ],
        out_shape=(
            jax.ShapeDtypeStruct((N, D), jnp.float32),
            jax.ShapeDtypeStruct((N, K), jnp.float32),
        ),
        compiler_params=pltpu.CompilerParams(
            dimension_semantics=("parallel",),
            vmem_limit_bytes=vmem_limit),
        cost_estimate=pl.CostEstimate(
            flops=flops,
            transcendentals=N * KL,
            bytes_accessed=bytes_accessed),
    )(x16, We16, be2, W1f, b1f, w2_cols, b2f)

    attn_scores = [scores[:, k:k + 1] for k in range(K)]   # list of (N, 1)
    return attn_scores, h


def _init_params(key, n_feats, hidden, latent, n_attns):
    ks = jax.random.split(key, 7)
    scale_e = 1.0 / jnp.sqrt(n_feats)
    scale_1 = 1.0 / jnp.sqrt(hidden)
    scale_2 = 1.0 / jnp.sqrt(latent)
    We = jax.random.normal(ks[0], (n_feats, hidden), jnp.float32) * scale_e
    be = jax.random.normal(ks[1], (1, hidden), jnp.float32) * scale_e
    W1 = jax.random.normal(ks[2], (n_attns, hidden, latent), jnp.float32) * scale_1
    b1 = jax.random.normal(ks[3], (n_attns, 1, latent), jnp.float32) * scale_1
    W2 = jax.random.normal(ks[4], (n_attns, latent, 1), jnp.float32) * scale_2
    b2 = jax.random.normal(ks[5], (n_attns, 1, 1), jnp.float32) * scale_2
    return We, be, W1, b1, W2, b2


if __name__ == "__main__":
    N, F, D, L, K = 8, 32, 32, 16, 3   # instances, features, hidden, latent, branches

    key = jax.random.PRNGKey(0)
    kx, kp = jax.random.split(key)
    x = jax.random.normal(kx, (N, F), jnp.float32)
    We, be, W1, b1, W2, b2 = _init_params(kp, F, D, L, K)

    attn_scores, enc = encode_and_multiple_attend(x, We, be, W1, b1, W2, b2)
    jax.block_until_ready(enc)
    jax.block_until_ready(attn_scores)

    # pure-JAX f32 reference; bf16 MXU operands => loosened tolerance.
    h_ref = jnp.maximum(x @ We + be, 0.0)
    ref_scores = [jnp.tanh(h_ref @ W1[k] + b1[k]) @ W2[k] + b2[k] for k in range(K)]
    assert enc.shape == (N, D)
    assert jnp.allclose(enc, h_ref, atol=3e-2, rtol=3e-2)
    for k in range(K):
        assert attn_scores[k].shape == (N, 1)
        assert jnp.allclose(attn_scores[k], ref_scores[k], atol=3e-2, rtol=3e-2)

    print("KERNEL_OK")
</pallas_src>

<mosaic_0001>
module attributes {stable_mosaic.version = 11 : i64} {
  func.func @_encode_attend_kernel(%arg0: i32, %arg1: memref<8x32xbf16, #tpu.memory_space<vmem>>, %arg2: memref<32x32xbf16, #tpu.memory_space<vmem>>, %arg3: memref<1x32xf32, #tpu.memory_space<vmem>>, %arg4: memref<32x48xbf16, #tpu.memory_space<vmem>>, %arg5: memref<1x48xf32, #tpu.memory_space<vmem>>, %arg6: memref<48x3xf32, #tpu.memory_space<vmem>>, %arg7: memref<1x3xf32, #tpu.memory_space<vmem>>, %arg8: memref<8x32xf32, #tpu.memory_space<vmem>>, %arg9: memref<8x3xf32, #tpu.memory_space<vmem>>) attributes {dimension_semantics = [#tpu.dimension_semantics<parallel>], iteration_bounds = array<i64: 1>, scalar_prefetch = 0 : i64, scratch_operands = 0 : i64, tpu.core_type = #tpu.core_type<tc>, window_params = [{transform_indices = @transform_0, window_bounds = array<i64: 8, 32>}, {pipeline_mode = #tpu.pipeline_mode<synchronous>, transform_indices = @transform_1, window_bounds = array<i64: 32, 32>}, {pipeline_mode = #tpu.pipeline_mode<synchronous>, transform_indices = @transform_2, window_bounds = array<i64: 1, 32>}, {pipeline_mode = #tpu.pipeline_mode<synchronous>, transform_indices = @transform_3, window_bounds = array<i64: 32, 48>}, {pipeline_mode = #tpu.pipeline_mode<synchronous>, transform_indices = @transform_4, window_bounds = array<i64: 1, 48>}, {pipeline_mode = #tpu.pipeline_mode<synchronous>, transform_indices = @transform_5, window_bounds = array<i64: 48, 3>}, {pipeline_mode = #tpu.pipeline_mode<synchronous>, transform_indices = @transform_6, window_bounds = array<i64: 1, 3>}, {transform_indices = @transform_7, window_bounds = array<i64: 8, 32>}, {transform_indices = @transform_8, window_bounds = array<i64: 8, 3>}]} {
    %c0 = arith.constant 0 : index
    %c0_0 = arith.constant 0 : index
    %0 = vector.load %arg1[%c0, %c0_0] : memref<8x32xbf16, #tpu.memory_space<vmem>>, vector<8x32xbf16>
    %c0_1 = arith.constant 0 : index
    %c0_2 = arith.constant 0 : index
    %1 = vector.load %arg2[%c0_1, %c0_2] : memref<32x32xbf16, #tpu.memory_space<vmem>>, vector<32x32xbf16>
    %cst = arith.constant dense<0.000000e+00> : vector<8x32xf32>
    %2 = tpu.matmul %0, %1, %cst {dimension_numbers = #tpu.dot_dimension_numbers<[1], [0], [0], [1], [0, 0, 1, 1], [], []>} : vector<8x32xbf16>, vector<32x32xbf16>, vector<8x32xf32> -> vector<8x32xf32>
    %c0_3 = arith.constant 0 : index
    %c0_4 = arith.constant 0 : index
    %3 = vector.load %arg3[%c0_3, %c0_4] : memref<1x32xf32, #tpu.memory_space<vmem>>, vector<1x32xf32>
    %4 = vector.broadcast %3 : vector<1x32xf32> to vector<8x32xf32>
    %5 = arith.addf %2, %4 : vector<8x32xf32>
    %cst_5 = arith.constant 0.000000e+00 : f32
    %6 = vector.broadcast %cst_5 : f32 to vector<8x32xf32>
    %7 = arith.maximumf %5, %6 : vector<8x32xf32>
    %c0_6 = arith.constant 0 : index
    %c0_7 = arith.constant 0 : index
    %8 = vector.load %arg8[%c0_6, %c0_7] : memref<8x32xf32, #tpu.memory_space<vmem>>, vector<8x32xf32>
    tpu.vector_store %arg8[%c0_6, %c0_7], %7 {strides = array<i32>} : memref<8x32xf32, #tpu.memory_space<vmem>>, vector<8x32xf32>,
    %9 = arith.truncf %7 : vector<8x32xf32> to vector<8x32xbf16>
    %c0_8 = arith.constant 0 : index
    %c0_9 = arith.constant 0 : index
    %10 = vector.load %arg4[%c0_8, %c0_9] : memref<32x48xbf16, #tpu.memory_space<vmem>>, vector<32x48xbf16>
    %cst_10 = arith.constant dense<0.000000e+00> : vector<8x48xf32>
    %11 = tpu.matmul %9, %10, %cst_10 {dimension_numbers = #tpu.dot_dimension_numbers<[1], [0], [0], [1], [0, 0, 1, 1], [], []>} : vector<8x32xbf16>, vector<32x48xbf16>, vector<8x48xf32> -> vector<8x48xf32>
    %c0_11 = arith.constant 0 : index
    %c0_12 = arith.constant 0 : index
    %12 = vector.load %arg5[%c0_11, %c0_12] : memref<1x48xf32, #tpu.memory_space<vmem>>, vector<1x48xf32>
    %13 = vector.broadcast %12 : vector<1x48xf32> to vector<8x48xf32>
    %14 = arith.addf %11, %13 : vector<8x48xf32>
    %15 = math.tanh %14 : vector<8x48xf32>
    %c0_13 = arith.constant 0 : index
    %c0_14 = arith.constant 0 : index
    %16 = vector.load %arg6[%c0_13, %c0_14] : memref<48x3xf32, #tpu.memory_space<vmem>>, vector<48x3xf32>
    %cst_15 = arith.constant dense<0.000000e+00> : vector<8x3xf32>
    %17 = tpu.matmul %15, %16, %cst_15 {dimension_numbers = #tpu.dot_dimension_numbers<[1], [0], [0], [1], [0, 0, 1, 1], [], []>} : vector<8x48xf32>, vector<48x3xf32>, vector<8x3xf32> -> vector<8x3xf32>
    %c0_16 = arith.constant 0 : index
    %c0_17 = arith.constant 0 : index
    %18 = vector.load %arg7[%c0_16, %c0_17] : memref<1x3xf32, #tpu.memory_space<vmem>>, vector<1x3xf32>
    %19 = vector.broadcast %18 : vector<1x3xf32> to vector<8x3xf32>
    %20 = arith.addf %17, %19 : vector<8x3xf32>
    %c0_18 = arith.constant 0 : index
    %c0_19 = arith.constant 0 : index
    %21 = vector.load %arg9[%c0_18, %c0_19] : memref<8x3xf32, #tpu.memory_space<vmem>>, vector<8x3xf32>
    tpu.vector_store %arg9[%c0_18, %c0_19], %20 {strides = array<i32>} : memref<8x3xf32, #tpu.memory_space<vmem>>, vector<8x3xf32>,
    return
  }
  func.func @transform_0(%arg0: i32) -> (i32, i32) {
    %c0_i32 = arith.constant 0 : i32
    %c0_i32_0 = arith.constant 0 : i32
    return %arg0, %c0_i32 : i32, i32
  }
  func.func @transform_1(%arg0: i32) -> (i32, i32) {
    %c0_i32 = arith.constant 0 : i32
    %c0_i32_0 = arith.constant 0 : i32
    %c0_i32_1 = arith.constant 0 : i32
    return %c0_i32, %c0_i32_0 : i32, i32
  }
  func.func @transform_2(%arg0: i32) -> (i32, i32) {
    %c0_i32 = arith.constant 0 : i32
    %c0_i32_0 = arith.constant 0 : i32
    %c0_i32_1 = arith.constant 0 : i32
    return %c0_i32, %c0_i32_0 : i32, i32
  }
  func.func @transform_3(%arg0: i32) -> (i32, i32) {
    %c0_i32 = arith.constant 0 : i32
    %c0_i32_0 = arith.constant 0 : i32
    %c0_i32_1 = arith.constant 0 : i32
    return %c0_i32, %c0_i32_0 : i32, i32
  }
  func.func @transform_4(%arg0: i32) -> (i32, i32) {
    %c0_i32 = arith.constant 0 : i32
    %c0_i32_0 = arith.constant 0 : i32
    %c0_i32_1 = arith.constant 0 : i32
    return %c0_i32, %c0_i32_0 : i32, i32
  }
  func.func @transform_5(%arg0: i32) -> (i32, i32) {
    %c0_i32 = arith.constant 0 : i32
    %c0_i32_0 = arith.constant 0 : i32
    %c0_i32_1 = arith.constant 0 : i32
    return %c0_i32, %c0_i32_0 : i32, i32
  }
  func.func @transform_6(%arg0: i32) -> (i32, i32) {
    %c0_i32 = arith.constant 0 : i32
    %c0_i32_0 = arith.constant 0 : i32
    %c0_i32_1 = arith.constant 0 : i32
    return %c0_i32, %c0_i32_0 : i32, i32
  }
  func.func @transform_7(%arg0: i32) -> (i32, i32) {
    %c0_i32 = arith.constant 0 : i32
    %c0_i32_0 = arith.constant 0 : i32
    return %arg0, %c0_i32 : i32, i32
  }
  func.func @transform_8(%arg0: i32) -> (i32, i32) {
    %c0_i32 = arith.constant 0 : i32
    %c0_i32_0 = arith.constant 0 : i32
    return %arg0, %c0_i32 : i32, i32
  }
}

</mosaic_0001>

<bundles_post_ra>
// kernel: encode_and_multiple_attend.1
= control target key start
LH: loop header
LB: loop body
LE: loop exit
PB: predicated region body
PF: predicated region fallthrough
CT: control target
= control target key end

     0   :  { %v360_v1 = vmov 0.0   ;;  %vm361_vm0 = vmmov 0   ;;  %s459_s0 = inlined_call_operand.vmem [shape: bf16[8,32], index: 0, kind: input, shape index: {}]   ;;  %s460_s1 = inlined_call_operand.vmem [shape: bf16[32,32], index: 1, kind: input, shape index: {}]   ;;  %s461_s2 = inlined_call_operand.vmem [shape: f32[1,32], index: 2, kind: input, shape index: {}]   ;;  %s462_s3 = inlined_call_operand.vmem [shape: bf16[32,48], index: 3, kind: input, shape index: {}]   ;;  %s463_s4 = inlined_call_operand.vmem [shape: f32[1,48], index: 4, kind: input, shape index: {}]   ;;  %s464_s5 = inlined_call_operand.vmem [shape: f32[48,3], index: 5, kind: input, shape index: {}]   ;;  %s465_s6 = inlined_call_operand.vmem [shape: f32[1,3], index: 6, kind: input, shape index: {}]   ;;  %s466_s7 = inlined_call_operand.hbm [shape: f32[8,32], index: 7, kind: output, shape index: {0}]   ;;  %s467_s8 = inlined_call_operand.vmem [shape: f32[8,3], index: 8, kind: output, shape index: {1}]  }
   0x1   :  { %v332_v0 = vld [vmem:[%s460_s1 + $0x8] sm:$0xff]   ;;  %298 = vmatprep.subr.bf16.mxu0 %v360_v1  ;;  %306 = vmatprep.subr.bf16.mxu1 %v360_v1  ;;  %v333_v2 = vld [vmem:[%s460_s1] sm:$0xff]  }
   0x2   :  { %299 = vmatpush3.bf16.msra.mxu0 %v332_v0  ;;  %302 = vmatprep.mubr.msk.bf16.mxu0 %vm361_vm0, %v360_v1 }
   0x3   :  { %300 = vmatprep.subr.bf16.mxu0 %v360_v1  ;;  %310 = vmatprep.mubr.msk.bf16.mxu1 %vm361_vm0, %v360_v1 }
   0x4   :  { %14 = vsyncpa [#allocation3], 0  ;;  %v30_v3 = vld [vmem:[%s459_s0] sm:$0xf]  ;;  %vm54_vm1 = vcmask 261120   ;;  %v334_v4 = vld [vmem:[%s462_s3 + $0x8] sm:$0xff]  }
   0x5   :  { %307 = vmatpush3.bf16.msra.mxu1 %v334_v4  ;;  %v335_v5 = vld [vmem:[%s462_s3] sm:$0xff]   ;;  %v173_v14 = vld [vmem:[%s464_s5 + $0x28] sm:$0xff]  ;;  %v171_v16 = vld [vmem:[%s464_s5 + $0x18] sm:$0xff]  ;;  %vm181_vm2 = vcmask 392192   ;;  %s362_s27 = smov [#allocation2]  }
   0x6   :  { %301 = vmatpush3.bf16.msra.mxu0 %v333_v2  ;;  %308 = vmatprep.subr.bf16.mxu1 %v360_v1  ;;  %v275_v6 = vld [vmem:[%s461_s2] ss:$0 sm:$0xff]  ;;  %v170_v17 = vld [vmem:[%s464_s5 + $0x10] sm:$0xff]  ;;  %v169_v18 = vld [vmem:[%s464_s5 + $0x8] sm:$0xff]  ;;  %s263_s28 = sshll.u32 %s362_s27, 4  ;;  %s264_s28 = int_to_ptr.vmem [resolvable:$true] %s263_s28 }
   0x7   :  { %314 = vmatprep.subr.mxu0 %v360_v1  ;;  %v172_v15 = vld [vmem:[%s464_s5 + $0x20] sm:$0xff]  ;;  %p343_p1 = scmp.lt.s32.totalorder %s264_s28, %s264_s28 }
   0x8   :  { %v168_v19 = vld [vmem:[%s464_s5] sm:$0xff]  ;;  %s338_s5 = scalar_lea.vmem %s264_s28, 128 }
   0x9   :  { %303 = vmatmul.mubr.msk.bf16.vlgmr.msra.gmra.mxu0 %vm54_vm1, %v30_v3  ;;  %309 = vmatpush3.bf16.msra.mxu1 %v335_v5  ;;  %v279_v20 = vld [vmem:[%s463_s4] ss:$0 sm:$0xff]  ;;  %p339_p0 = scmp.ne.s32.totalorder %s264_s28, %s338_s5  ;;  %p344_p2 = scmp.lt.s32.totalorder %s338_s5, %s338_s5 }
   0xa   :  { %326 = vmatprep.mubr.msk.f32.mxu0 %vm361_vm0, %v360_v1  ;;  %315 = vmatpush3.msra.mxu0 %v173_v14 }
   0xb   :  { %316 = vmatprep.subr.mxu0 %v360_v1  ;;  %p345_p3 = por %p344_p2, %p343_p1 }
   0xc   :  { %317 = vmatpush3.msra.mxu0 %v172_v15 }
   0xd   :  { %318 = vmatprep.subr.mxu0 %v360_v1  ;;  %p346_p4 = pnand %p345_p3, %p339_p0 }
   0xe   :  { %319 = vmatpush3.msra.mxu0 %v171_v16 }
   0xf   :  { %320 = vmatprep.subr.mxu0 %v360_v1 }
  0x10   :  { %321 = vmatpush3.msra.mxu0 %v170_v17 }
  0x11   :  { %322 = vmatprep.subr.mxu0 %v360_v1 }
  0x12   :  { %323 = vmatpush3.msra.mxu0 %v169_v18 }
  0x13   :  { %324 = vmatprep.subr.mxu0 %v360_v1 }
  0x14   :  { %325 = vmatpush3.msra.mxu0 %v168_v19 }
  0xc9   :  { %v92_v7 = vpop.f32.mrf.mxu0 }
  0xca   :  { %v93_v8 = vadd.f32 %v275_v6, %v92_v7 }
  0xcb   :  { %v304_v9 = vpop.f32.mrf.mxu0 }
  0xcc   :  { %v98_v10 = vmax.f32 %v93_v8, 0.0 }
  0xcd   :  { %v95_v11 = vpop.f32.mrf.mxu0 }
  0xce   :  { %v100_v12 = vpack.c.bf16 %v98_v10, %v98_v10  ;;  %99 = vst.msk [vmem:[#allocation2] sm:$0xff] %vm54_vm1, %v98_v10 }
  0xcf   :  { %v305_v13 = vpop.f32.mrf.mxu0 }
  0xd0   :  { %311 = vmatmul.mubr.msk.bf16.vlgmr.msra.gmra.mxu1 %vm54_vm1, %v100_v12 }
 0x190   :  { %v161_v21 = vpop.f32.mrf.mxu1 }
 0x191   :  { %v162_v22 = vadd.f32 %v279_v20, %v161_v21 }
 0x192   :  { %v312_v23 = vpop.f32.mrf.mxu1 }
 0x193   :  { %336 = vtanh.f32 %v162_v22 }
 0x194   :  { %v164_v24 = vpop.f32.mrf.mxu1 }
 0x196   :  { %v313_v25 = vpop.f32.mrf.mxu1 }
 0x1a0   :  { %v337_v26 = vpop.eup %336 }
 0x1a1   :  { %327 = vmatmul.mubr.msk.f32.vlgmr.msra.gmra.mxu0 %vm181_vm2, %v337_v26 }
 0x1a2   :  { %349 = shalt.err (!%p346_p4)
}
 0x1a3   :  { %266 = dma.vmem_to_hbm [thread:$0]  %s264_s28, 128, %s466_s7, [#allocation3]   ;;  %v283_v27 = vld [vmem:[%s465_s6] ss:$0 sm:$0xff]  ;;  %vm255_vm3 = vcmask 23552  }
 0x261   :  { %v251_v28 = vpop.f32.mrf.mxu0 }
 0x262   :  { %v252_v29 = vadd.f32 %v283_v27, %v251_v28 }
 0x263   :  { %v328_v30 = vpop.f32.mrf.mxu0 }
 0x264   :  { %256 = vst.msk [vmem:[%s467_s8] sm:$0xff] %vm255_vm3, %v252_v29 }
 0x265   :  { %358 = dma.done.wait [#allocation3], 128  }
 0x266   :  { %359 = vsyncadd [#allocation3], 4294967168 }
 0x267   :  { %274 = vsyncpa [#allocation3], 1 }

</bundles_post_ra>
